<compile_context>
chip_gen: v5e
topology: v5e:2x2
jax: 0.10.0
libtpu: 0.0.40
codegen_flags: <defaults>
</compile_context>

<pallas_src>
import jax
import jax.numpy as jnp
from jax.experimental import pallas as pl
from jax.experimental.pallas import tpu as pltpu

# ---- static problem sizes (consistent with the module) ----
N = 8            # number of graph nodes
CIN = 8          # in_channels
HEADS = 2        # heads
COUT = 4         # out_channels (per head) == final classes
OUT_C = COUT
HC = HEADS * COUT          # 8   GATConv concat width
HN = HEADS * N             # 16  head-stacked rows
MEGA = HN * OUT_C          # 64  fused (head,node,class) columns
NEG_SLOPE = 0.2            # Python float -> jaxpr literal
NEG_INF = -1e30            # Python float -> jaxpr literal

# ---- packed parameter buffer layout: f32 [PBUF_ROWS, 128] (lane-padded) ----
PBUF_COLS = 128
R_WCOMB = 0      # [w1 | w1@a_dst_bd]     [CIN, HC+HEADS]   rows   0..7
R_ASRCT = 8      # (w1@a_src_bd)^T        [HEADS, CIN]      rows   8..9
R_SELN = 16      # node duplicator        [HN, N]           rows  16..31
R_HSEL = 32      # head selector          [HN, HEADS]       rows  32..47
R_ONESH = 48     # ones                   [HEADS, N]        rows  48..49
R_ONESROW = 56   # ones                   [1, HN]           row   56
R_W2 = 64        # W2mega                 [HC, MEGA]        rows  64..71
R_DIAG = 72      # diag selector          [HN, MEGA]        rows  72..87
R_FOLD = 88      # class fold (padded)    [MEGA, 128]       rows  88..151
R_B2 = 152       # b2_eff / -inf pad      [1, 128]          row  152
PBUF_ROWS = 160


def gat_kernel(adj_ref, x_ref, xT_ref, p_ref, out_ref):
    adj2 = adj_ref[0]                                    # [HN, N]
    x = x_ref[0]                                         # [N, CIN]
    xT = xT_ref[0]                                       # [CIN, N]

    # ---- projection + dst attention scores in ONE matmul (folded through w1) ----
    wcomb = p_ref[R_WCOMB:R_WCOMB + CIN, 0:HC + HEADS]   # [CIN, HC+HEADS]
    hz = jnp.dot(x, wcomb, preferred_element_type=jnp.float32)   # [N, HC+HEADS]
    h = hz[:, 0:HC]                                      # [N, HC]
    pd = hz[:, HC:HC + HEADS]                            # [N, HEADS] dst scores

    # src scores with nodes along lanes, straight from xT (pure MXU, no transpose)
    w1asrcT = p_ref[R_ASRCT:R_ASRCT + HEADS, 0:CIN]      # [HEADS, CIN]
    srcT = jnp.dot(w1asrcT, xT, preferred_element_type=jnp.float32)  # [HEADS, N]

    # ---- head-stacked attention logits via constant selector matmuls (MXU) ----
    seln = p_ref[R_SELN:R_SELN + HN, 0:N]                # [HN, N]
    hsel = p_ref[R_HSEL:R_HSEL + HN, 0:HEADS]            # [HN, HEADS]
    ones_hn = p_ref[R_ONESH:R_ONESH + HEADS, 0:N]        # [HEADS, N]

    pd2 = jnp.dot(seln, pd, preferred_element_type=jnp.float32)          # [HN, HEADS]
    dstb = jnp.dot(pd2 * hsel, ones_hn, preferred_element_type=jnp.float32)  # [HN, N]
    srcb = jnp.dot(hsel, srcT, preferred_element_type=jnp.float32)       # [HN, N]

    # e[k*N+i, j] = leaky_relu(a_dst_k.h_i + a_src_k.h_j), masked softmax over j
    e = dstb + srcb
    e = jnp.where(e > 0.0, e, NEG_SLOPE * e)
    e = jnp.where(adj2 > 0.0, e, NEG_INF)
    e = e - jnp.max(e, axis=-1, keepdims=True)
    pexp = jnp.exp(e)                                    # masked entries -> 0
    attn = pexp * pl.reciprocal(jnp.sum(pexp, axis=-1, keepdims=True),
                                approx=True)             # [HN, N]

    # ---- fused aggregation + flatten + final Linear ----
    w2m = p_ref[R_W2:R_W2 + HC, 0:MEGA]                  # [HC, MEGA]
    t = jnp.dot(h, w2m, preferred_element_type=jnp.float32)       # [N, MEGA]
    u = jnp.dot(attn, t, preferred_element_type=jnp.float32)      # [HN, MEGA]
    diag = p_ref[R_DIAG:R_DIAG + HN, 0:MEGA]             # block-diag selector
    ones_row = p_ref[R_ONESROW:R_ONESROW + 1, 0:HN]      # [1, HN]
    s = jnp.dot(ones_row, u * diag, preferred_element_type=jnp.float32)  # [1, MEGA]

    fold = p_ref[R_FOLD:R_FOLD + MEGA, 0:PBUF_COLS]      # [MEGA, 128] (padded)
    b2pad = p_ref[R_B2:R_B2 + 1, 0:PBUF_COLS]            # [1, 128] (-inf beyond 4)
    logits = jnp.dot(s, fold, preferred_element_type=jnp.float32) + b2pad

    # ---- softmax over classes (padded lanes carry -1e30 -> exp underflows to 0) ----
    logits = logits - jnp.max(logits, axis=-1, keepdims=True)
    ez = jnp.exp(logits)
    probs = ez * pl.reciprocal(jnp.sum(ez, axis=-1, keepdims=True), approx=True)
    out_ref[0] = probs                                   # lane-dense [1, 128] store


def pack_params(params):
    """One-time host-side packing of all weights/constants into pbuf [160, 128]."""
    w1 = params["w1"]                                    # [CIN, HC]
    att_src, att_dst = params["att_src"], params["att_dst"]   # [HEADS, COUT]

    a_dst_bd = jnp.zeros((HC, HEADS), jnp.float32)
    a_src_bd = jnp.zeros((HC, HEADS), jnp.float32)
    for k in range(HEADS):
        a_dst_bd = a_dst_bd.at[k * COUT:(k + 1) * COUT, k].set(att_dst[k])
        a_src_bd = a_src_bd.at[k * COUT:(k + 1) * COUT, k].set(att_src[k])
    wcomb = jnp.concatenate([w1, w1 @ a_dst_bd], axis=1)         # [CIN, HC+HEADS]
    w1asrcT = (w1 @ a_src_bd).T                                  # [HEADS, CIN]

    seln = jnp.tile(jnp.eye(N, dtype=jnp.float32), (HEADS, 1))           # [HN, N]
    hsel = jnp.repeat(jnp.eye(HEADS, dtype=jnp.float32), N, axis=0)      # [HN, HEADS]
    ones_h_n = jnp.ones((HEADS, N), jnp.float32)
    ones_row = jnp.ones((HN,), jnp.float32)

    # W2mega[a*COUT+c, (b*N+i)*OUT_C+o] = delta_ab * w2[o, i*HC + b*COUT + c]
    w2_r = params["w2"].reshape(OUT_C, N, HEADS, COUT)           # [o, i, k, c]
    w2_p = jnp.transpose(w2_r, (2, 3, 1, 0))                     # [k, c, i, o]
    eye_h = jnp.eye(HEADS, dtype=jnp.float32)
    w2_mega = jnp.einsum("ab,bcio->acbio", eye_h, w2_p).reshape(HC, MEGA)
    diag = jnp.repeat(jnp.eye(HN, dtype=jnp.float32), OUT_C, axis=1)     # [HN, MEGA]
    fold128 = jnp.zeros((MEGA, PBUF_COLS), jnp.float32)
    fold128 = fold128.at[:, :OUT_C].set(
        jnp.tile(jnp.eye(OUT_C, dtype=jnp.float32), (HN, 1)))
    # GATConv bias folded through the final Linear; pad lanes carry -inf so the
    # class softmax ignores them.
    bias_rep = jnp.tile(params["bias1"][0], (N,))                        # [N*HC]
    b2_eff = params["b2"][0] + params["w2"] @ bias_rep                   # [OUT_C]
    b2pad = jnp.full((PBUF_COLS,), NEG_INF, jnp.float32).at[:OUT_C].set(b2_eff)

    pbuf = jnp.zeros((PBUF_ROWS, PBUF_COLS), jnp.float32)
    pbuf = pbuf.at[R_WCOMB:R_WCOMB + CIN, 0:HC + HEADS].set(wcomb)
    pbuf = pbuf.at[R_ASRCT:R_ASRCT + HEADS, 0:CIN].set(w1asrcT)
    pbuf = pbuf.at[R_SELN:R_SELN + HN, 0:N].set(seln)
    pbuf = pbuf.at[R_HSEL:R_HSEL + HN, 0:HEADS].set(hsel)
    pbuf = pbuf.at[R_ONESH:R_ONESH + HEADS, 0:N].set(ones_h_n)
    pbuf = pbuf.at[R_ONESROW, 0:HN].set(ones_row)
    pbuf = pbuf.at[R_W2:R_W2 + HC, 0:MEGA].set(w2_mega)
    pbuf = pbuf.at[R_DIAG:R_DIAG + HN, 0:MEGA].set(diag)
    pbuf = pbuf.at[R_FOLD:R_FOLD + MEGA, :].set(fold128)
    pbuf = pbuf.at[R_B2, :].set(b2pad)
    return pbuf


def _build_adj2(edge_index):
    """edge_index [2, E] (row0=src, row1=dst) -> head-stacked mask [HN, N]."""
    src, dst = edge_index[0], edge_index[1]
    adj = jnp.zeros((N, N), jnp.float32).at[dst, src].set(1.0)
    idx = jnp.arange(N)
    adj = adj.at[idx, idx].set(1.0)                      # self loops
    return jnp.concatenate([adj, adj], axis=0)


def _gat_pallas(adj2s, xs, pbuf):
    """adj2s [B,HN,N], xs [B,N,CIN], pbuf [160,128] -> [B, OUT_C]."""
    B = xs.shape[0]
    xTs = jnp.swapaxes(xs, 1, 2)                         # [B, CIN, N]
    out_pad = pl.pallas_call(
        gat_kernel,
        grid=(B,),
        in_specs=[
            pl.BlockSpec((1, HN, N), lambda b: (b, 0, 0)),        # adjacency mask
            pl.BlockSpec((1, N, CIN), lambda b: (b, 0, 0)),       # x
            pl.BlockSpec((1, CIN, N), lambda b: (b, 0, 0)),       # x^T
            pl.BlockSpec((PBUF_ROWS, PBUF_COLS), lambda b: (0, 0)),  # weights: resident
        ],
        out_specs=pl.BlockSpec((1, 1, PBUF_COLS), lambda b: (b, 0, 0)),
        out_shape=jax.ShapeDtypeStruct((B, 1, PBUF_COLS), jnp.float32),
        compiler_params=pltpu.CompilerParams(
            dimension_semantics=("parallel",)),
    )(adj2s, xs, xTs, pbuf)
    return out_pad[:, 0, :OUT_C]


@jax.jit
def gat_forward(x, edge_index, pbuf):
    """Single-graph forward (module signature). x [N,CIN], edge_index [2,E]."""
    adj2 = _build_adj2(edge_index)
    return _gat_pallas(adj2[None], x[None], pbuf)        # [1, OUT_C]


@jax.jit
def gat_forward_batched(xs, edge_indices, pbuf):
    """Batched forward: xs [B,N,CIN], edge_indices [B,2,E] -> [B, OUT_C]."""
    adj2s = jax.vmap(_build_adj2)(edge_indices)
    return _gat_pallas(adj2s, xs, pbuf)


def gat_reference(x, edge_index, params):
    """Pure-JAX reference with identical semantics (for sanity check)."""
    src, dst = edge_index[0], edge_index[1]
    adj = jnp.zeros((N, N), jnp.float32).at[dst, src].set(1.0)
    adj = adj.at[jnp.arange(N), jnp.arange(N)].set(1.0)
    h = x @ params["w1"]                                 # [N, HC]
    h3 = h.reshape(N, HEADS, COUT)
    a_s = jnp.sum(h3 * params["att_src"][None], -1)      # [N, H]
    a_d = jnp.sum(h3 * params["att_dst"][None], -1)      # [N, H]
    e = a_d[:, None, :] + a_s[None, :, :]                # [i, j, H]
    e = jnp.where(e > 0, e, NEG_SLOPE * e)
    e = jnp.where(adj[:, :, None] > 0, e, NEG_INF)
    e = e - e.max(1, keepdims=True)
    p = jnp.exp(e) * adj[:, :, None]
    attn = p / p.sum(1, keepdims=True)
    out = jnp.einsum("ijh,jhc->ihc", attn, h3).reshape(N, HC) + params["bias1"]
    flat = out.reshape(-1)
    logits = flat @ params["w2"].T + params["b2"][0]
    return jax.nn.softmax(logits)[None, :]


def init_params(key):
    ks = jax.random.split(key, 6)
    scale1 = 1.0 / jnp.sqrt(CIN)
    return {
        "w1": jax.random.normal(ks[0], (CIN, HC), jnp.float32) * scale1,
        "att_src": jax.random.normal(ks[1], (HEADS, COUT), jnp.float32) * 0.3,
        "att_dst": jax.random.normal(ks[2], (HEADS, COUT), jnp.float32) * 0.3,
        "bias1": jax.random.normal(ks[3], (1, HC), jnp.float32) * 0.1,
        "w2": jax.random.normal(ks[4], (OUT_C, N * HC), jnp.float32)
              / jnp.sqrt(N * HC),
        "b2": jax.random.normal(ks[5], (1, OUT_C), jnp.float32) * 0.1,
    }


if __name__ == "__main__":
    key = jax.random.PRNGKey(0)
    kx, kp, ke, kb = jax.random.split(key, 4)
    params = init_params(kp)
    pbuf = pack_params(params)           # one-time packing

    # ---- single graph (the module's forward signature) ----
    x = jax.random.normal(kx, (N, CIN), jnp.float32)
    edge_index = jnp.array(
        [[0, 1, 2, 3, 4, 5, 6, 7, 0, 2, 4, 6],
         [1, 2, 3, 4, 5, 6, 7, 0, 3, 5, 7, 1]], dtype=jnp.int32)
    out1 = jax.block_until_ready(gat_forward(x, edge_index, pbuf))
    ref1 = gat_reference(x, edge_index, params)
    assert out1.shape == (1, OUT_C)
    assert jnp.allclose(out1, ref1, atol=2e-3, rtol=2e-3), (out1, ref1)

    # ---- batched: B graphs in one pallas_call (parallel grid, resident weights) ----
    B = 16
    E = edge_index.shape[1]
    xs = jax.random.normal(kb, (B, N, CIN), jnp.float32)
    src = jax.random.randint(ke, (B, E), 0, N, dtype=jnp.int32)
    dst = jax.random.randint(jax.random.fold_in(ke, 1), (B, E), 0, N,
                             dtype=jnp.int32)
    edge_indices = jnp.stack([src, dst], axis=1)          # [B, 2, E]
    outB = jax.block_until_ready(gat_forward_batched(xs, edge_indices, pbuf))
    refB = jax.vmap(lambda xx, ee: gat_reference(xx, ee, params)[0])(
        xs, edge_indices)
    assert outB.shape == (B, OUT_C)
    assert jnp.allclose(outB, refB, atol=2e-3, rtol=2e-3), (outB, refB)
    assert jnp.allclose(jnp.sum(outB, axis=-1), 1.0, atol=5e-3)
    print("KERNEL_OK")
</pallas_src>

<mosaic_0001>
module attributes {stable_mosaic.version = 11 : i64} {
  func.func @gat_kernel(%arg0: i32, %arg1: memref<1x16x8xf32, #tpu.memory_space<vmem>>, %arg2: memref<1x8x8xf32, #tpu.memory_space<vmem>>, %arg3: memref<1x8x8xf32, #tpu.memory_space<vmem>>, %arg4: memref<160x128xf32, #tpu.memory_space<vmem>>, %arg5: memref<1x1x128xf32, #tpu.memory_space<vmem>>) attributes {dimension_semantics = [#tpu.dimension_semantics<parallel>], iteration_bounds = array<i64: 1>, scalar_prefetch = 0 : i64, scratch_operands = 0 : i64, tpu.core_type = #tpu.core_type<tc>, window_params = [{transform_indices = @transform_0, window_bounds = array<i64: 1, 16, 8>}, {transform_indices = @transform_1, window_bounds = array<i64: 1, 8, 8>}, {transform_indices = @transform_2, window_bounds = array<i64: 1, 8, 8>}, {pipeline_mode = #tpu.pipeline_mode<synchronous>, transform_indices = @transform_3, window_bounds = array<i64: 160, 128>}, {transform_indices = @transform_4, window_bounds = array<i64: 1, 1, 128>}]} {
    %c0 = arith.constant 0 : index
    %c0_0 = arith.constant 0 : index
    %c0_1 = arith.constant 0 : index
    %0 = vector.load %arg1[%c0, %c0_0, %c0_1] : memref<1x16x8xf32, #tpu.memory_space<vmem>>, vector<1x16x8xf32>
    %1 = vector.shape_cast %0 : vector<1x16x8xf32> to vector<16x8xf32>
    %c0_2 = arith.constant 0 : index
    %c0_3 = arith.constant 0 : index
    %c0_4 = arith.constant 0 : index
    %2 = vector.load %arg2[%c0_2, %c0_3, %c0_4] : memref<1x8x8xf32, #tpu.memory_space<vmem>>, vector<1x8x8xf32>
    %3 = vector.shape_cast %2 : vector<1x8x8xf32> to vector<8x8xf32>
    %c0_5 = arith.constant 0 : index
    %c0_6 = arith.constant 0 : index
    %c0_7 = arith.constant 0 : index
    %4 = vector.load %arg3[%c0_5, %c0_6, %c0_7] : memref<1x8x8xf32, #tpu.memory_space<vmem>>, vector<1x8x8xf32>
    %5 = vector.shape_cast %4 : vector<1x8x8xf32> to vector<8x8xf32>
    %c0_8 = arith.constant 0 : index
    %c0_9 = arith.constant 0 : index
    %6 = vector.load %arg4[%c0_8, %c0_9] : memref<160x128xf32, #tpu.memory_space<vmem>>, vector<8x10xf32>
    %cst = arith.constant dense<0.000000e+00> : vector<8x10xf32>
    %7 = tpu.matmul %3, %6, %cst {dimension_numbers = #tpu.dot_dimension_numbers<[1], [0], [0], [1], [0, 0, 1, 1], [], []>} : vector<8x8xf32>, vector<8x10xf32>, vector<8x10xf32> -> vector<8x10xf32>
    %8 = vector.extract_strided_slice %7 {offsets = [0, 0], sizes = [8, 8], strides = [1, 1]} : vector<8x10xf32> to vector<8x8xf32>
    %9 = vector.extract_strided_slice %7 {offsets = [0, 8], sizes = [8, 2], strides = [1, 1]} : vector<8x10xf32> to vector<8x2xf32>
    %c8 = arith.constant 8 : index
    %c0_10 = arith.constant 0 : index
    %10 = vector.load %arg4[%c8, %c0_10] : memref<160x128xf32, #tpu.memory_space<vmem>>, vector<2x8xf32>
    %cst_11 = arith.constant dense<0.000000e+00> : vector<2x8xf32>
    %11 = tpu.matmul %10, %5, %cst_11 {dimension_numbers = #tpu.dot_dimension_numbers<[1], [0], [0], [1], [0, 0, 1, 1], [], []>} : vector<2x8xf32>, vector<8x8xf32>, vector<2x8xf32> -> vector<2x8xf32>
    %c16 = arith.constant 16 : index
    %c0_12 = arith.constant 0 : index
    %12 = vector.load %arg4[%c16, %c0_12] : memref<160x128xf32, #tpu.memory_space<vmem>>, vector<16x8xf32>
    %c32 = arith.constant 32 : index
    %c0_13 = arith.constant 0 : index
    %13 = vector.load %arg4[%c32, %c0_13] : memref<160x128xf32, #tpu.memory_space<vmem>>, vector<16x2xf32>
    %c48 = arith.constant 48 : index
    %c0_14 = arith.constant 0 : index
    %14 = vector.load %arg4[%c48, %c0_14] : memref<160x128xf32, #tpu.memory_space<vmem>>, vector<2x8xf32>
    %cst_15 = arith.constant dense<0.000000e+00> : vector<16x2xf32>
    %15 = tpu.matmul %12, %9, %cst_15 {dimension_numbers = #tpu.dot_dimension_numbers<[1], [0], [0], [1], [0, 0, 1, 1], [], []>} : vector<16x8xf32>, vector<8x2xf32>, vector<16x2xf32> -> vector<16x2xf32>
    %16 = arith.mulf %15, %13 : vector<16x2xf32>
    %cst_16 = arith.constant dense<0.000000e+00> : vector<16x8xf32>
    %17 = tpu.matmul %16, %14, %cst_16 {dimension_numbers = #tpu.dot_dimension_numbers<[1], [0], [0], [1], [0, 0, 1, 1], [], []>} : vector<16x2xf32>, vector<2x8xf32>, vector<16x8xf32> -> vector<16x8xf32>
    %cst_17 = arith.constant dense<0.000000e+00> : vector<16x8xf32>
    %18 = tpu.matmul %13, %11, %cst_17 {dimension_numbers = #tpu.dot_dimension_numbers<[1], [0], [0], [1], [0, 0, 1, 1], [], []>} : vector<16x2xf32>, vector<2x8xf32>, vector<16x8xf32> -> vector<16x8xf32>
    %19 = arith.addf %17, %18 : vector<16x8xf32>
    %cst_18 = arith.constant 0.000000e+00 : f32
    %20 = vector.broadcast %cst_18 : f32 to vector<16x8xf32>
    %21 = arith.cmpf ogt, %19, %20 : vector<16x8xf32>
    %cst_19 = arith.constant 2.000000e-01 : f32
    %22 = vector.broadcast %cst_19 : f32 to vector<16x8xf32>
    %23 = arith.mulf %22, %19 : vector<16x8xf32>
    %24 = arith.select %21, %19, %23 : vector<16x8xi1>, vector<16x8xf32>
    %cst_20 = arith.constant 0.000000e+00 : f32
    %25 = vector.broadcast %cst_20 : f32 to vector<16x8xf32>
    %26 = arith.cmpf ogt, %1, %25 : vector<16x8xf32>
    %cst_21 = arith.constant -1.000000e+30 : f32
    %27 = vector.broadcast %cst_21 : f32 to vector<16x8xf32>
    %28 = arith.select %26, %24, %27 : vector<16x8xi1>, vector<16x8xf32>
    %cst_22 = arith.constant dense<0xFF800000> : vector<16xf32>
    %29 = vector.multi_reduction <maximumf>, %28, %cst_22 [1] : vector<16x8xf32> to vector<16xf32>
    %30 = vector.shape_cast %29 : vector<16xf32> to vector<16x1xf32>
    %31 = vector.broadcast %30 : vector<16x1xf32> to vector<16x8xf32>
    %32 = arith.subf %28, %31 : vector<16x8xf32>
    %33 = math.exp %32 : vector<16x8xf32>
    %cst_23 = arith.constant dense<0.000000e+00> : vector<16xf32>
    %34 = vector.multi_reduction <add>, %33, %cst_23 [1] : vector<16x8xf32> to vector<16xf32>
    %35 = vector.shape_cast %34 : vector<16xf32> to vector<16x1xf32>
    %36 = tpu.reciprocal %35 {approx = true} : vector<16x1xf32> -> vector<16x1xf32>
    %37 = vector.broadcast %36 : vector<16x1xf32> to vector<16x8xf32>
    %38 = arith.mulf %33, %37 : vector<16x8xf32>
    %c64 = arith.constant 64 : index
    %c0_24 = arith.constant 0 : index
    %39 = vector.load %arg4[%c64, %c0_24] : memref<160x128xf32, #tpu.memory_space<vmem>>, vector<8x64xf32>
    %cst_25 = arith.constant dense<0.000000e+00> : vector<8x64xf32>
    %40 = tpu.matmul %8, %39, %cst_25 {dimension_numbers = #tpu.dot_dimension_numbers<[1], [0], [0], [1], [0, 0, 1, 1], [], []>} : vector<8x8xf32>, vector<8x64xf32>, vector<8x64xf32> -> vector<8x64xf32>
    %cst_26 = arith.constant dense<0.000000e+00> : vector<16x64xf32>
    %41 = tpu.matmul %38, %40, %cst_26 {dimension_numbers = #tpu.dot_dimension_numbers<[1], [0], [0], [1], [0, 0, 1, 1], [], []>} : vector<16x8xf32>, vector<8x64xf32>, vector<16x64xf32> -> vector<16x64xf32>
    %c72 = arith.constant 72 : index
    %c0_27 = arith.constant 0 : index
    %42 = vector.load %arg4[%c72, %c0_27] : memref<160x128xf32, #tpu.memory_space<vmem>>, vector<16x64xf32>
    %c56 = arith.constant 56 : index
    %c0_28 = arith.constant 0 : index
    %43 = vector.load %arg4[%c56, %c0_28] : memref<160x128xf32, #tpu.memory_space<vmem>>, vector<1x16xf32>
    %44 = arith.mulf %41, %42 : vector<16x64xf32>
    %cst_29 = arith.constant dense<0.000000e+00> : vector<1x64xf32>
    %45 = tpu.matmul %43, %44, %cst_29 {dimension_numbers = #tpu.dot_dimension_numbers<[1], [0], [0], [1], [0, 0, 1, 1], [], []>} : vector<1x16xf32>, vector<16x64xf32>, vector<1x64xf32> -> vector<1x64xf32>
    %c88 = arith.constant 88 : index
    %c0_30 = arith.constant 0 : index
    %46 = vector.load %arg4[%c88, %c0_30] : memref<160x128xf32, #tpu.memory_space<vmem>>, vector<64x128xf32>
    %c152 = arith.constant 152 : index
    %c0_31 = arith.constant 0 : index
    %47 = vector.load %arg4[%c152, %c0_31] : memref<160x128xf32, #tpu.memory_space<vmem>>, vector<1x128xf32>
    %cst_32 = arith.constant dense<0.000000e+00> : vector<1x128xf32>
    %48 = tpu.matmul %45, %46, %cst_32 {dimension_numbers = #tpu.dot_dimension_numbers<[1], [0], [0], [1], [0, 0, 1, 1], [], []>} : vector<1x64xf32>, vector<64x128xf32>, vector<1x128xf32> -> vector<1x128xf32>
    %49 = arith.addf %48, %47 : vector<1x128xf32>
    %cst_33 = arith.constant dense<0xFF800000> : vector<1xf32>
    %50 = vector.multi_reduction <maximumf>, %49, %cst_33 [1] : vector<1x128xf32> to vector<1xf32>
    %51 = vector.shape_cast %50 : vector<1xf32> to vector<1x1xf32>
    %52 = vector.broadcast %51 : vector<1x1xf32> to vector<1x128xf32>
    %53 = arith.subf %49, %52 : vector<1x128xf32>
    %54 = math.exp %53 : vector<1x128xf32>
    %cst_34 = arith.constant dense<0.000000e+00> : vector<1xf32>
    %55 = vector.multi_reduction <add>, %54, %cst_34 [1] : vector<1x128xf32> to vector<1xf32>
    %56 = vector.shape_cast %55 : vector<1xf32> to vector<1x1xf32>
    %57 = tpu.reciprocal %56 {approx = true} : vector<1x1xf32> -> vector<1x1xf32>
    %58 = vector.broadcast %57 : vector<1x1xf32> to vector<1x128xf32>
    %59 = arith.mulf %54, %58 : vector<1x128xf32>
    %c0_35 = arith.constant 0 : index
    %c0_36 = arith.constant 0 : index
    %c0_37 = arith.constant 0 : index
    %60 = vector.load %arg5[%c0_35, %c0_36, %c0_37] : memref<1x1x128xf32, #tpu.memory_space<vmem>>, vector<1x1x128xf32>
    %61 = vector.shape_cast %60 : vector<1x1x128xf32> to vector<1x128xf32>
    %62 = vector.shape_cast %59 : vector<1x128xf32> to vector<1x1x128xf32>
    tpu.vector_store %arg5[%c0_35, %c0_36, %c0_37], %62 {strides = array<i32>} : memref<1x1x128xf32, #tpu.memory_space<vmem>>, vector<1x1x128xf32>,
    return
  }
  func.func @transform_0(%arg0: i32) -> (i32, i32, i32) {
    %c0_i32 = arith.constant 0 : i32
    %c0_i32_0 = arith.constant 0 : i32
    %c0_i32_1 = arith.constant 0 : i32
    return %arg0, %c0_i32, %c0_i32_0 : i32, i32, i32
  }
  func.func @transform_1(%arg0: i32) -> (i32, i32, i32) {
    %c0_i32 = arith.constant 0 : i32
    %c0_i32_0 = arith.constant 0 : i32
    %c0_i32_1 = arith.constant 0 : i32
    return %arg0, %c0_i32, %c0_i32_0 : i32, i32, i32
  }
  func.func @transform_2(%arg0: i32) -> (i32, i32, i32) {
    %c0_i32 = arith.constant 0 : i32
    %c0_i32_0 = arith.constant 0 : i32
    %c0_i32_1 = arith.constant 0 : i32
    return %arg0, %c0_i32, %c0_i32_0 : i32, i32, i32
  }
  func.func @transform_3(%arg0: i32) -> (i32, i32) {
    %c0_i32 = arith.constant 0 : i32
    %c0_i32_0 = arith.constant 0 : i32
    %c0_i32_1 = arith.constant 0 : i32
    return %c0_i32, %c0_i32_0 : i32, i32
  }
  func.func @transform_4(%arg0: i32) -> (i32, i32, i32) {
    %c0_i32 = arith.constant 0 : i32
    %c0_i32_0 = arith.constant 0 : i32
    %c0_i32_1 = arith.constant 0 : i32
    return %arg0, %c0_i32, %c0_i32_0 : i32, i32, i32
  }
}

</mosaic_0001>

<bundles_post_ra>
// kernel: gat_forward.1
= control target key start
LH: loop header
LB: loop body
LE: loop exit
PB: predicated region body
PF: predicated region fallthrough
CT: control target
= control target key end

     0   :  { %vm22_vm0 = vcmask 64512   ;;  %vm117_vm1 = vcmask 1041408   ;;  %vm110_vm2 = vcmask 15360   ;;  %vm265_vm7 = vcmask 130048   ;;  %s483_s3 = inlined_call_operand.vmem [shape: f32[160,128], index: 3, kind: input, shape index: {}]   ;;  %s484_s1 = inlined_call_operand.vmem [shape: f32[1,8,8], index: 1, kind: input, shape index: {}]   ;;  %s485_s2 = inlined_call_operand.vmem [shape: f32[1,8,8], index: 2, kind: input, shape index: {}]   ;;  %s486_s0 = inlined_call_operand.vmem [shape: f32[1,16,8], index: 0, kind: input, shape index: {}]   ;;  %s487_s4 = inlined_call_operand.vmem [shape: f32[1,1,128], index: 4, kind: output, shape index: {}]  }
   0x1   :  { %v21_v0 = vld [vmem:[%s483_s3] sm:$0xff]  ;;  %v46_v3 = vld [vmem:[%s483_s3 + $0x8] sm:$0x3]  ;;  %v70_v8 = vld [vmem:[%s483_s3 + $0x10] sm:$0xff]  ;;  %vm298_vm8 = vcmask 523264   ;;  %vm322_vm9 = vcmask 1040384  }
   0x2   :  { %v19_v1 = vld [vmem:[%s484_s1] sm:$0xff]  ;;  %41 = vmatpush.msra.mxu0 %v21_v0  ;;  %s367_s1 = smov 120   ;;  %v71_v10 = vld [vmem:[%s483_s3 + $0x18] sm:$0xff]  ;;  %v74_v12 = vld [vmem:[%s483_s3 + $0x30] sm:$0x3] }
   0x3   :  { %v20_v2 = vld [vmem:[%s485_s2] sm:$0xff]  ;;  %339 = vmatmul.msk.f32.vlgmr.msra.gmra.mxu0 %vm22_vm0, %v19_v1  ;;  %v73_v13 = vld [vmem:[%s483_s3 + $0x28] sm:$0xff]  ;;  %v296_v50 = vld [vmem:[%s483_s3 + $0x90] sm:$0xff] }
   0x4   :  { %65 = vmatpush.msra.mxu1 %v20_v2  ;;  %v208_v4 = vld [vmem:[%s483_s3 + $0x40] sm:$0xff]  ;;  %346 = vmatpush.msk.msrb.mxu0 %vm117_vm1, %v74_v12  ;;  %v18_v28 = vld [vmem:[%s486_s0 + $0x8] sm:$0xff]  ;;  %v293_v53 = vld [vmem:[%s483_s3 + $0x78] sm:$0xff] }
   0x5   :  { %340 = vmatmul.msk.f32.vlgmr.msra.gmra.mxu1 %vm22_vm0, %v46_v3  ;;  %v72_v7 = vld [vmem:[%s483_s3 + $0x20] sm:$0xff]  ;;  %vm183_vm6 = vcmp.gt.f32.partialorder %v18_v28, 0.0  ;;  %v295_v51 = vld [vmem:[%s483_s3 + $0x88] sm:$0xff]  ;;  %v292_v54 = vld [vmem:[%s483_s3 + $0x70] sm:$0xff] }
   0x6   :  { %226 = vmatpush.msrb.mxu1 %v208_v4  ;;  %v17_v20 = vld [vmem:[%s486_s0] sm:$0xff]  ;;  %v291_v55 = vld [vmem:[%s483_s3 + $0x68] sm:$0xff]  ;;  %v261_v58 = vld [vmem:[%s483_s3 + $0x50] sm:$0xff] }
   0x7   :  { %vm182_vm4 = vcmp.gt.f32.partialorder %v17_v20, 0.0  ;;  %v294_v52 = vld [vmem:[%s483_s3 + $0x80] sm:$0xff]  ;;  %v260_v59 = vld [vmem:[%s483_s3 + $0x48] sm:$0xff]  ;;  %v262_v63 = vld [vmem:[%s483_s3 + $0x38] sm:$0x1] }
   0x8   :  { %v290_v56 = vld [vmem:[%s483_s3 + $0x60] sm:$0xff]  ;;  %v289_v0 = vld [vmem:[%s483_s3 + $0x58] sm:$0xff] }
   0x9   :  { %v297_v2 = vld [vmem:[%s483_s3 + $0x98] sm:$0x1] }
  0x80   :  { %v43_v5 = vpop.f32.mrf.mxu0 }
  0x81   :  { %76 = vrot.lane.b32.xlu0 %v43_v5, %s367_s1  ;;  %349 = vmatmul.msk.f32.vlgmr.msrb.gmra.mxu1 %vm22_vm0, %v43_v5 }
  0x82   :  { %v67_v6 = vpop.f32.mrf.mxu1 }
  0x83   :  { %343 = vmatpush.msk.msra.mxu3 %vm117_vm1, %v67_v6 }
  0x84   :  { %344 = vmatmul.msk.f32.vlgmr.msra.gmra.mxu3 %vm110_vm2, %v72_v7 }
  0x85   :  { %310 = vmatpush.msrb.mxu3 %v296_v50 }
  0x87   :  { %311 = vmatpush.msrb.mxu3 %v295_v51 }
  0x89   :  { %312 = vmatpush.msrb.mxu3 %v294_v52 }
  0x8b   :  { %313 = vmatpush.msrb.mxu3 %v293_v53 }
  0x8c   :  { %345 = vmatmul.msk.f32.gmra.mxu3 %vm110_vm2, %v73_v13 }
  0x8d   :  { %314 = vmatpush.msrb.mxu3 %v292_v54 }
  0x8f   :  { %315 = vmatpush.msrb.mxu3 %v291_v55 }
  0x91   :  { %316 = vmatpush.msrb.mxu3 %v290_v56 }
  0x93   :  { %317 = vmatpush.msrb.mxu3 %v289_v0 }
  0xf3   :  { %v77_v9 = vpop.permute.xlu0 %76 }
  0xf4   :  { %100 = vmatpush.msra.mxu2 %v77_v9 }
  0xf5   :  { %341 = vmatmul.msk.f32.vlgmr.msra.gmra.mxu2 %vm22_vm0, %v70_v8 }
  0xfd   :  { %342 = vmatmul.msk.f32.gmra.mxu2 %vm22_vm0, %v71_v10 }
  0xfe   :  { %v228_v11 = vpop.f32.mrf.mxu1 }
  0xff   :  { %252 = vmatpush.msra.mxu1 %v228_v11 }
 0x107   :  { %v138_v18 = vpop.f32.mrf.mxu3 }
 0x10f   :  { %v141_v24 = vpop.f32.mrf.mxu3 }
 0x178   :  { %v102_v14 = vpop.f32.mrf.mxu2 }
 0x179   :  { %v108_v15 = vmul.f32 %v102_v14, %v72_v7 }
 0x17b   :  { %347 = vmatmul.msk.f32.vlgmr.msrb.gmra.mxu0 %vm110_vm2, %v108_v15 }
 0x180   :  { %v105_v16 = vpop.f32.mrf.mxu2 }
 0x181   :  { %v109_v17 = vmul.f32 %v105_v16, %v73_v13 }
 0x183   :  { %348 = vmatmul.msk.f32.gmra.mxu0 %vm110_vm2, %v109_v17 }
 0x1f8   :  { %v170_v19 = vpop.f32.mrf.mxu0 }
 0x1f9   :  { %v171_v21 = vadd.f32 %v170_v19, %v138_v18 }
 0x1fb   :  { %v178_v22 = vmul.f32 0.2, %v171_v21  ;;  %vm176_vm3 = vcmp.gt.f32.partialorder %v171_v21, 0.0 }
 0x1fd   :  { %v180_v23 = vsel %vm176_vm3, %v171_v21, %v178_v22 }
 0x1fe   :  { %v184_v25 = vsel %vm182_vm4, %v180_v23, -1e+30 }
 0x1ff   :  { %v186_v26 = vsel %vm22_vm0, %v184_v25, -inf }
 0x200   :  { %v173_v27 = vpop.f32.mrf.mxu0  ;;  %187 = vmax.xlane.f32.xlu0 %v186_v26 }
 0x201   :  { %v174_v29 = vadd.f32 %v173_v27, %v141_v24 }
 0x203   :  { %v179_v30 = vmul.f32 0.2, %v174_v29  ;;  %vm177_vm5 = vcmp.gt.f32.partialorder %v174_v29, 0.0 }
 0x205   :  { %v181_v31 = vsel %vm177_vm5, %v174_v29, %v179_v30 }
 0x206   :  { %v185_v32 = vsel %vm183_vm6, %v181_v31, -1e+30 }
 0x207   :  { %v189_v33 = vsel %vm22_vm0, %v185_v32, -inf }
 0x208   :  { %190 = vmax.xlane.f32.xlu1 %v189_v33 }
 0x273   :  { %v188_v34 = vpop.xlane.xlu0 %187 }
 0x274   :  { %v192_v35 = vsub.f32 %v184_v25, %v188_v34 }
 0x276   :  { %v194_v36 = vmul.f32 1.442695, %v192_v35 }
 0x278   :  { %355 = vpow2.f32 %v194_v36 }
 0x27b   :  { %v191_v37 = vpop.xlane.xlu1 %190 }
 0x27c   :  { %v193_v38 = vsub.f32 %v185_v32, %v191_v37 }
 0x27e   :  { %v356_v39 = vpop.eup %355  ;;  %v196_v40 = vmul.f32 1.442695, %v193_v38 }
 0x27f   :  { %v198_v41 = vsel %vm22_vm0, %v356_v39, 0.0 }
 0x280   :  { %357 = vpow2.f32 %v196_v40  ;;  %199 = vadd.xlane.f32.xlu1 %v198_v41 }
 0x286   :  { %v358_v42 = vpop.eup %357 }
 0x287   :  { %v201_v43 = vsel %vm22_vm0, %v358_v42, 0.0 }
 0x288   :  { %202 = vadd.xlane.f32.xlu2 %v201_v43 }
 0x2f3   :  { %v200_v44 = vpop.xlane.xlu1 %199 }
 0x2f4   :  { %359 = vrcp.f32 %v200_v44 }
 0x2fa   :  { %v360_v45 = vpop.eup %359 }
 0x2fb   :  { %v206_v46 = vmul.f32 %v360_v45, %v356_v39  ;;  %v203_v47 = vpop.xlane.xlu2 %202 }
 0x2fc   :  { %361 = vrcp.f32 %v203_v47 }
 0x2fd   :  { %350 = vmatmul.msk.f32.vlgmr.msra.gmra.mxu1 %vm22_vm0, %v206_v46 }
 0x302   :  { %v362_v48 = vpop.eup %361 }
 0x303   :  { %v207_v49 = vmul.f32 %v362_v48, %v358_v42 }
 0x305   :  { %351 = vmatmul.msk.f32.gmra.mxu1 %vm22_vm0, %v207_v49 }
 0x37a   :  { %v254_v57 = vpop.f32.mrf.mxu1 }
 0x37b   :  { %v263_v62 = vmul.f32 %v260_v59, %v254_v57 }
 0x382   :  { %v257_v60 = vpop.f32.mrf.mxu1 }
 0x383   :  { %v264_v61 = vmul.f32 %v261_v58, %v257_v60 }
 0x385   :  { %283 = vmatpush.msrb.mxu2 %v264_v61 }
 0x387   :  { %284 = vmatpush.msrb.mxu2 %v263_v62 }
 0x388   :  { %352 = vmatmul.msk.f32.vlgmr.msrb.gmra.mxu2 %vm265_vm7, %v262_v63 }
 0x40b   :  { %v286_v1 = vpop.f32.mrf.mxu2 }
 0x40c   :  { %353 = vmatmul.msk.f32.vlgmr.msrb.gmra.mxu3 %vm298_vm8, %v286_v1 }
 0x48f   :  { %v319_v3 = vpop.f32.mrf.mxu3 }
 0x490   :  { %v320_v4 = vadd.f32 %v319_v3, %v297_v2 }
 0x492   :  { %v323_v5 = vsel %vm322_vm9, %v320_v4, -inf }
 0x493   :  { %324 = vmax.xlane.f32.xlu2 %v323_v5 }
 0x506   :  { %v325_v6 = vpop.xlane.xlu2 %324 }
 0x507   :  { %v326_v7 = vsub.f32 %v320_v4, %v325_v6 }
 0x509   :  { %v327_v8 = vmul.f32 1.442695, %v326_v7 }
 0x50b   :  { %363 = vpow2.f32 %v327_v8 }
 0x511   :  { %v364_v9 = vpop.eup %363 }
 0x512   :  { %v329_v10 = vsel %vm322_vm9, %v364_v9, 0.0 }
 0x513   :  { %330 = vadd.xlane.f32.xlu1 %v329_v10 }
 0x586   :  { %v331_v11 = vpop.xlane.xlu1 %330 }
 0x587   :  { %365 = vrcp.f32 %v331_v11 }
 0x58d   :  { %v366_v12 = vpop.eup %365 }
 0x58e   :  { %v333_v13 = vmul.f32 %v366_v12, %v364_v9 }
 0x590   :  { %334 = vst [vmem:[%s487_s4] sm:$0x1] %v333_v13 }

</bundles_post_ra>
